<compile_context>
chip_gen: v6e
topology: v6e:2x2x1
jax: 0.10.0
libtpu: 0.0.40
codegen_flags: <defaults>
</compile_context>

<pallas_src>
import math

import jax
import jax.numpy as jnp
from jax import lax
from jax.experimental import pallas as pl
from jax.experimental.pallas import tpu as pltpu


def _round_up(x, m):
    return ((x + m - 1) // m) * m


def _pad_bytes(rows, cols, itemsize=4):
    """Approximate VMEM bytes of a (rows, cols) block after (8,128) tiling."""
    sub = 8 * (4 // itemsize) if itemsize < 4 else 8
    return _round_up(max(rows, 1), sub) * _round_up(max(cols, 1), 128) * itemsize


def _device_kind():
    try:
        return jax.devices()[0].device_kind.lower()
    except Exception:
        return ""


def _num_tensorcores(kind):
    # v2/v3/v5e/v6e expose one TensorCore per device; v4/v5p megacore and v7x
    # expose two -> only those benefit from forcing >=2 grid steps.
    if any(t in kind for t in ("lite", "v5e", "v6e", "v2", "v3")):
        return 1
    if any(t in kind for t in ("v4", "v5p", "7")):
        return 2
    return 1


def _vmem_budget_bytes():
    try:
        cap = int(pltpu.get_tpu_info().vmem_capacity_bytes)
    except Exception:
        cap = 64 * 1024 * 1024          # conservative: v7x per-core VMEM
    # Leave ~25% headroom for Mosaic internal scratch / semaphores.
    return (cap // 4) * 3


def _tcn_matmul_kernel(x_ref, w_ref, b_ref, o_ref):
    """x_ref: (1, tm, K); w_ref: (K, NT); b_ref: (1, NT); o_ref: (tm, NT)."""
    acc = jnp.dot(x_ref[0], w_ref[...], preferred_element_type=jnp.float32)
    o_ref[...] = (acc + b_ref[...]).astype(o_ref.dtype)


def _pack_tile_weights(weights, biases, kernel_set, c_in, tt):
    """Block-Toeplitz weight / tiled bias for one time tile of `tt` output steps.

    Returns:
      w_tile: ((tt + k_max - 1) * C_in, tt * C_total)
      b_tile: (1, tt * C_total)
    Input-window flattening is (time-step major, channel minor); branch k uses
    the last k taps of each k_max-wide window (off = k_max - k zero rows).
    """
    k_max = kernel_set[-1]
    cols = []
    for i, k in enumerate(kernel_set):
        w = weights[i][:, :, 0, :]                              # (c_out_i, C_in, k)
        w = jnp.transpose(w, (2, 1, 0)).reshape(k * c_in, -1)   # (k*C_in, c_out_i)
        w = jnp.pad(w, (((k_max - k) * c_in, 0), (0, 0)))       # (k_max*C_in, c_out_i)
        cols.append(w)
    wp = jnp.concatenate(cols, axis=1)                          # (k_max*C_in, C_total)
    c_total = wp.shape[1]
    blocks = [jnp.pad(wp, ((s * c_in, (tt - 1 - s) * c_in), (0, 0)))
              for s in range(tt)]
    w_tile = jnp.concatenate(blocks, axis=1)                    # ((tt+k_max-1)*C_in, tt*C_total)
    b_cat = jnp.concatenate(list(biases))                       # (C_total,)
    b_tile = jnp.tile(b_cat, tt).reshape(1, tt * c_total)
    return w_tile, b_tile


def _choose_time_tile(t_out, c_in, c_total, k_max, target_k):
    """Output steps per time tile. Returns (tt, n_tt); n_tt == 1 means untiled."""
    g = 128 // math.gcd(128, c_total)   # keep tt*C_total a multiple of 128 when tiled
    tt = max(1, target_k // max(c_in, 1) - (k_max - 1))   # K ~ MXU contraction depth
    tt = max(g, (tt // g) * g)
    while tt > g and (tt + k_max - 1) * c_in * tt * c_total * 4 > (8 << 20):
        tt -= g                          # cap the shared weight tile at ~8 MiB
    if t_out <= tt:
        return t_out, 1
    n_tt = pl.cdiv(t_out, tt)
    tt = _round_up(pl.cdiv(t_out, n_tt), g)   # rebalance to minimize tail padding
    n_tt = pl.cdiv(t_out, tt)
    return tt, n_tt


def _vmem_estimate(tm, k_w, nt, in_itemsize):
    # Double-buffered input/output blocks; weight counted double-buffered too
    # (conservative: the pl.Buffered(1) request may not be honored).
    return (2 * _pad_bytes(tm, k_w, in_itemsize)
            + 2 * _pad_bytes(k_w, nt, in_itemsize)
            + 2 * _pad_bytes(8, nt, 4)
            + 2 * _pad_bytes(tm, nt, 4))


def _choose_row_tile(m, n_tt, n_tc, k_w, nt, budget, in_itemsize):
    m8 = _round_up(max(m, 1), 8)
    cap = min(512, m8)
    if n_tc >= 2 and n_tt == 1 and m8 >= 16:
        # Only on 2-TensorCore parts: keep >=2 total grid steps so both cores work.
        cap = min(cap, _round_up(pl.cdiv(m, 2), 8))
    for tm in sorted({512, 256, 128, 64, 32, 16, 8, cap}, reverse=True):
        if tm > cap:
            continue
        if _vmem_estimate(tm, k_w, nt, in_itemsize) <= budget:
            return tm
    return 8


def tcn_inception(x_nchw, weights, biases, kernel_set, c_out_set,
                  padding=None, compute_dtype=None):
    """Fused TCNInception forward.

    x_nchw  : (B, C_in, N, T)
    weights : list of (c_out_i, C_in, 1, k_i)  (PyTorch OIHW)
    biases  : list of (c_out_i,)
    compute_dtype: optional (e.g. jnp.bfloat16) to halve HBM/VMEM traffic;
                   accumulation stays f32.
    Returns : (B, sum(c_out_set), N, T_out)
    """
    if list(kernel_set) != sorted(kernel_set):
        raise ValueError("kernel_set must be sorted ascending (TCNInception contract)")
    B, C_in, N, T = x_nchw.shape
    k_max = kernel_set[-1]
    if padding is None:
        padding = k_max - 1
    Tp = T + padding
    T_out = Tp - k_max + 1
    if T_out < 1:
        raise ValueError("T + padding must be >= max kernel size")
    C_total = sum(c_out_set)
    M = B * N

    kind = _device_kind()
    n_tc = _num_tensorcores(kind)
    budget = _vmem_budget_bytes()
    in_itemsize = jnp.dtype(compute_dtype or x_nchw.dtype).itemsize
    target_k = 128 if "v5" in kind else 256   # MXU contraction depth per generation

    tt, n_tt = _choose_time_tile(T_out, C_in, C_total, k_max, target_k)
    T_out_pad = tt * n_tt
    W = tt + k_max - 1                        # padded-time steps per window
    K_w = T * C_in if n_tt == 1 else W * C_in
    NT = tt * C_total

    tm = _choose_row_tile(M, n_tt, n_tc, K_w, NT, budget, in_itemsize)
    M_pad = _round_up(M, tm)
    grid = (M_pad // tm, n_tt)

    # ---- host-side glue: NCHW -> channels-last row windows -------------------
    x_rows = jnp.transpose(x_nchw, (0, 2, 3, 1)).reshape(M, T, C_in)
    x_rows = jnp.pad(x_rows, ((0, M_pad - M), (0, 0), (0, 0)))
    if n_tt == 1:
        # No host-side left time pad: its rows are dropped from the weight instead.
        x_win = x_rows.reshape(1, M_pad, T * C_in)
    else:
        right = T_out_pad - T_out
        xp = jnp.pad(x_rows, ((0, 0), (padding, right), (0, 0)))   # (M_pad, Tw, C_in)
        idx = jnp.arange(n_tt)[:, None] * tt + jnp.arange(W)[None, :]
        x_win = jnp.take(xp, idx, axis=1)                          # (M_pad, n_tt, W, C_in)
        x_win = jnp.transpose(x_win, (1, 0, 2, 3)).reshape(n_tt, M_pad, K_w)

    w_tile, b_tile = _pack_tile_weights(weights, biases, kernel_set, C_in, tt)
    if n_tt == 1:
        w_tile = w_tile[padding * C_in:]       # rows that only multiply zero padding
    if compute_dtype is not None:
        x_win = x_win.astype(compute_dtype)
        w_tile = w_tile.astype(compute_dtype)

    est = _vmem_estimate(tm, K_w, NT, in_itemsize)
    vmem_limit = int(min(budget, max(est + (8 << 20), min(32 << 20, budget))))

    out_shape = jax.ShapeDtypeStruct((M_pad, T_out_pad * C_total), x_nchw.dtype)
    x_spec = pl.BlockSpec((1, tm, K_w), lambda i, j: (j, i, 0))
    out_spec = pl.BlockSpec((tm, NT), lambda i, j: (i, j))
    cparams = pltpu.CompilerParams(
        dimension_semantics=("parallel", "parallel"),
        vmem_limit_bytes=vmem_limit)

    def _run(single_buffer_consts):
        kw = {"pipeline_mode": pl.Buffered(1)} if single_buffer_consts else {}
        w_spec = pl.BlockSpec((K_w, NT), lambda i, j: (0, 0), **kw)
        b_spec = pl.BlockSpec((1, NT), lambda i, j: (0, 0), **kw)
        return pl.pallas_call(
            _tcn_matmul_kernel,
            out_shape=out_shape,
            grid=grid,
            in_specs=[x_spec, w_spec, b_spec],
            out_specs=out_spec,
            compiler_params=cparams,
        )(x_win, w_tile, b_tile)

    try:
        # Weight/bias are grid-invariant: single-buffer them to halve their VMEM.
        out_flat = _run(True)
    except Exception:
        out_flat = _run(False)

    # ---- glue: back to NCHW ---------------------------------------------------
    out = out_flat[:M].reshape(B, N, T_out_pad, C_total)[:, :, :T_out, :]
    return jnp.transpose(out, (0, 3, 1, 2))     # (B, C_total, N, T_out)


def tcn_inception_reference(x_nchw, weights, biases, kernel_set, padding=None):
    """Pure-JAX reference matching the PyTorch forward exactly."""
    if padding is None:
        padding = kernel_set[-1] - 1
    xp = jnp.pad(x_nchw, ((0, 0), (0, 0), (0, 0), (padding, 0)))
    outs = []
    for i, _ in enumerate(kernel_set):
        o = lax.conv_general_dilated(
            xp, weights[i], window_strides=(1, 1), padding="VALID",
            dimension_numbers=("NCHW", "OIHW", "NCHW"))
        o = o + biases[i][None, :, None, None]
        outs.append(o)
    t_out = outs[-1].shape[-1]
    outs = [o[..., -t_out:] for o in outs]
    return jnp.concatenate(outs, axis=1)


if __name__ == "__main__":
    key = jax.random.PRNGKey(0)
    kernel_set = [1, 6, 7]
    c_out_set = [16, 8, 8]
    C_in = 4

    def make_params(key):
        weights, biases = [], []
        for i, k in enumerate(kernel_set):
            key, kw_, kb_ = jax.random.split(key, 3)
            bound = 1.0 / math.sqrt(C_in * k)   # PyTorch-style uniform init bound
            weights.append(jax.random.uniform(
                kw_, (c_out_set[i], C_in, 1, k), jnp.float32, -bound, bound))
            biases.append(jax.random.uniform(
                kb_, (c_out_set[i],), jnp.float32, -bound, bound))
        return key, weights, biases

    key, weights, biases = make_params(key)

    # Case 1: small module-default shape (single time tile, pad rows elided).
    B, N, T = 2, 16, 16
    key, kx = jax.random.split(key)
    x = jax.random.normal(kx, (B, C_in, N, T), dtype=jnp.float32)
    out = jax.block_until_ready(
        tcn_inception(x, weights, biases, kernel_set, c_out_set))
    ref = tcn_inception_reference(x, weights, biases, kernel_set)
    assert out.shape == ref.shape == (B, sum(c_out_set), N, T), out.shape
    assert jnp.allclose(out, ref, atol=1e-4, rtol=1e-4), "mismatch (case 1)"

    # Case 2: longer sequence exercising the time-tiled Toeplitz path.
    B2, N2, T2 = 2, 8, 96
    key, kx2 = jax.random.split(key)
    x2 = jax.random.normal(kx2, (B2, C_in, N2, T2), dtype=jnp.float32)
    out2 = jax.block_until_ready(
        tcn_inception(x2, weights, biases, kernel_set, c_out_set))
    ref2 = tcn_inception_reference(x2, weights, biases, kernel_set)
    assert out2.shape == ref2.shape, (out2.shape, ref2.shape)
    assert jnp.allclose(out2, ref2, atol=1e-4, rtol=1e-4), "mismatch (case 2)"

    print("KERNEL_OK")
</pallas_src>

<mosaic_0001>
module attributes {stable_mosaic.version = 11 : i64} {
  func.func @_tcn_matmul_kernel(%arg0: i32, %arg1: i32, %arg2: memref<1x32x64xf32, #tpu.memory_space<vmem>>, %arg3: memref<64x512xf32, #tpu.memory_space<vmem>>, %arg4: memref<1x512xf32, #tpu.memory_space<vmem>>, %arg5: memref<32x512xf32, #tpu.memory_space<vmem>>) attributes {dimension_semantics = [#tpu.dimension_semantics<parallel>, #tpu.dimension_semantics<parallel>], iteration_bounds = array<i64: 1, 1>, scalar_prefetch = 0 : i64, scratch_operands = 0 : i64, tpu.core_type = #tpu.core_type<tc>, window_params = [{transform_indices = @transform_0, window_bounds = array<i64: 1, 32, 64>}, {pipeline_mode = #tpu.pipeline_mode<synchronous>, transform_indices = @transform_1, window_bounds = array<i64: 64, 512>}, {pipeline_mode = #tpu.pipeline_mode<synchronous>, transform_indices = @transform_2, window_bounds = array<i64: 1, 512>}, {transform_indices = @transform_3, window_bounds = array<i64: 32, 512>}]} {
    %c0 = arith.constant 0 : index
    %c0_0 = arith.constant 0 : index
    %c0_1 = arith.constant 0 : index
    %0 = vector.load %arg2[%c0, %c0_0, %c0_1] : memref<1x32x64xf32, #tpu.memory_space<vmem>>, vector<1x32x64xf32>
    %1 = vector.shape_cast %0 : vector<1x32x64xf32> to vector<32x64xf32>
    %c0_2 = arith.constant 0 : index
    %c0_3 = arith.constant 0 : index
    %2 = vector.load %arg3[%c0_2, %c0_3] : memref<64x512xf32, #tpu.memory_space<vmem>>, vector<64x512xf32>
    %cst = arith.constant dense<0.000000e+00> : vector<32x512xf32>
    %3 = tpu.matmul %1, %2, %cst {dimension_numbers = #tpu.dot_dimension_numbers<[1], [0], [0], [1], [0, 0, 1, 1], [], []>} : vector<32x64xf32>, vector<64x512xf32>, vector<32x512xf32> -> vector<32x512xf32>
    %c0_4 = arith.constant 0 : index
    %c0_5 = arith.constant 0 : index
    %4 = vector.load %arg4[%c0_4, %c0_5] : memref<1x512xf32, #tpu.memory_space<vmem>>, vector<1x512xf32>
    %5 = vector.broadcast %4 : vector<1x512xf32> to vector<32x512xf32>
    %6 = arith.addf %3, %5 : vector<32x512xf32>
    %c0_6 = arith.constant 0 : index
    %c0_7 = arith.constant 0 : index
    %7 = vector.load %arg5[%c0_6, %c0_7] : memref<32x512xf32, #tpu.memory_space<vmem>>, vector<32x512xf32>
    tpu.vector_store %arg5[%c0_6, %c0_7], %6 {strides = array<i32>} : memref<32x512xf32, #tpu.memory_space<vmem>>, vector<32x512xf32>,
    return
  }
  func.func @transform_0(%arg0: i32, %arg1: i32) -> (i32, i32, i32) {
    %c0_i32 = arith.constant 0 : i32
    %c0_i32_0 = arith.constant 0 : i32
    return %arg1, %arg0, %c0_i32 : i32, i32, i32
  }
  func.func @transform_1(%arg0: i32, %arg1: i32) -> (i32, i32) {
    %c0_i32 = arith.constant 0 : i32
    %c0_i32_0 = arith.constant 0 : i32
    %c0_i32_1 = arith.constant 0 : i32
    return %c0_i32, %c0_i32_0 : i32, i32
  }
  func.func @transform_2(%arg0: i32, %arg1: i32) -> (i32, i32) {
    %c0_i32 = arith.constant 0 : i32
    %c0_i32_0 = arith.constant 0 : i32
    %c0_i32_1 = arith.constant 0 : i32
    return %c0_i32, %c0_i32_0 : i32, i32
  }
  func.func @transform_3(%arg0: i32, %arg1: i32) -> (i32, i32) {
    %c0_i32 = arith.constant 0 : i32
    return %arg0, %arg1 : i32, i32
  }
}

module attributes {stable_mosaic.version = 11 : i64} {
  func.func @_tcn_matmul_kernel(%arg0: i32, %arg1: i32, %arg2: memref<1x32x64xf32, #tpu.memory_space<vmem>>, %arg3: memref<64x512xf32, #tpu.memory_space<vmem>>, %arg4: memref<1x512xf32, #tpu.memory_space<vmem>>, %arg5: memref<32x512xf32, #tpu.memory_space<vmem>>) attributes {dimension_semantics = [#tpu.dimension_semantics<parallel>, #tpu.dimension_semantics<parallel>], iteration_bounds = array<i64: 1, 1>, scalar_prefetch = 0 : i64, scratch_operands = 0 : i64, tpu.core_type = #tpu.core_type<tc>, window_params = [{transform_indices = @transform_0, window_bounds = array<i64: 1, 32, 64>}, {pipeline_mode = #tpu.pipeline_mode<synchronous>, transform_indices = @transform_1, window_bounds = array<i64: 64, 512>}, {pipeline_mode = #tpu.pipeline_mode<synchronous>, transform_indices = @transform_2, window_bounds = array<i64: 1, 512>}, {transform_indices = @transform_3, window_bounds = array<i64: 32, 512>}]} {
    %c0 = arith.constant 0 : index
    %c0_0 = arith.constant 0 : index
    %c0_1 = arith.constant 0 : index
    %0 = vector.load %arg2[%c0, %c0_0, %c0_1] : memref<1x32x64xf32, #tpu.memory_space<vmem>>, vector<1x32x64xf32>
    %1 = vector.shape_cast %0 : vector<1x32x64xf32> to vector<32x64xf32>
    %c0_2 = arith.constant 0 : index
    %c0_3 = arith.constant 0 : index
    %2 = vector.load %arg3[%c0_2, %c0_3] : memref<64x512xf32, #tpu.memory_space<vmem>>, vector<64x512xf32>
    %cst = arith.constant dense<0.000000e+00> : vector<32x512xf32>
    %3 = tpu.matmul %1, %2, %cst {dimension_numbers = #tpu.dot_dimension_numbers<[1], [0], [0], [1], [0, 0, 1, 1], [], []>} : vector<32x64xf32>, vector<64x512xf32>, vector<32x512xf32> -> vector<32x512xf32>
    %c0_4 = arith.constant 0 : index
    %c0_5 = arith.constant 0 : index
    %4 = vector.load %arg4[%c0_4, %c0_5] : memref<1x512xf32, #tpu.memory_space<vmem>>, vector<1x512xf32>
    %5 = vector.broadcast %4 : vector<1x512xf32> to vector<32x512xf32>
    %6 = arith.addf %3, %5 : vector<32x512xf32>
    %c0_6 = arith.constant 0 : index
    %c0_7 = arith.constant 0 : index
    %7 = vector.load %arg5[%c0_6, %c0_7] : memref<32x512xf32, #tpu.memory_space<vmem>>, vector<32x512xf32>
    tpu.vector_store %arg5[%c0_6, %c0_7], %6 {strides = array<i32>} : memref<32x512xf32, #tpu.memory_space<vmem>>, vector<32x512xf32>,
    return
  }
  func.func @transform_0(%arg0: i32, %arg1: i32) -> (i32, i32, i32) {
    %c0_i32 = arith.constant 0 : i32
    %c0_i32_0 = arith.constant 0 : i32
    return %arg1, %arg0, %c0_i32 : i32, i32, i32
  }
  func.func @transform_1(%arg0: i32, %arg1: i32) -> (i32, i32) {
    %c0_i32 = arith.constant 0 : i32
    %c0_i32_0 = arith.constant 0 : i32
    %c0_i32_1 = arith.constant 0 : i32
    return %c0_i32, %c0_i32_0 : i32, i32
  }
  func.func @transform_2(%arg0: i32, %arg1: i32) -> (i32, i32) {
    %c0_i32 = arith.constant 0 : i32
    %c0_i32_0 = arith.constant 0 : i32
    %c0_i32_1 = arith.constant 0 : i32
    return %c0_i32, %c0_i32_0 : i32, i32
  }
  func.func @transform_3(%arg0: i32, %arg1: i32) -> (i32, i32) {
    %c0_i32 = arith.constant 0 : i32
    return %arg0, %arg1 : i32, i32
  }
}

</mosaic_0001>

<bundles_post_ra>
// kernel: tpu_custom_call.1
= control target key start
LH: loop header
LB: loop body
LE: loop exit
PB: predicated region body
PF: predicated region fallthrough
CT: control target
= control target key end

     0   :  { %8 = vsyncpa [#allocation3], 0  ;;  %s503_s0 = inlined_call_operand.hbm [shape: f32[1,32,64], index: 0, kind: input, shape index: {}]   ;;  %s504_s1 = inlined_call_operand.hbm [shape: f32[64,512], index: 1, kind: input, shape index: {}]   ;;  %s505_s2 = inlined_call_operand.hbm [shape: f32[1,512], index: 2, kind: input, shape index: {}]   ;;  %s506_s3 = inlined_call_operand.hbm [shape: f32[32,512], index: 3, kind: output, shape index: {}]  }
   0x1   :  { %9 = vsyncpa [#allocation6], 0 }
   0x2   :  { %10 = vsyncpa [#allocation4], 0  ;;  %s440_s12 = smov [#allocation5]  }
   0x3   :  { %s28_s13 = sshll.u32 %s440_s12, 4  ;;  %s29_s13 = int_to_ptr.vmem [resolvable:$true] %s28_s13 }
   0x4   :  { %s362_s14 = scalar_lea.vmem %s29_s13, 4096  ;;  %p367_p1 = scmp.lt.s32.totalorder %s29_s13, %s29_s13 }
   0x5   :  { %p363_p0 = scmp.ne.s32.totalorder %s29_s13, %s362_s14  ;;  %p368_p2 = scmp.lt.s32.totalorder %s362_s14, %s362_s14 }
   0x7   :  { %p369_p3 = por %p368_p2, %p367_p1 }
   0x9   :  { %p370_p4 = pnand %p369_p3, %p363_p0 }
   0xb   :  { %373 = shalt.err (!%p370_p4)
}
   0xc   :  { %s441_s15 = smov 512   ;;  %s442_s16 = smov 32  }
   0xd   :  { %34 = dma.hbm_to_vmem [thread:$0]  %s504_s1, 4096, %s29_s13, [#allocation6], %s441_s15, %s441_s15, %s442_s16  }
   0xe   :  { %s443_s19 = smov [#allocation2]  }
   0xf   :  { %s16_s20 = sshll.u32 %s443_s19, 4  ;;  %s17_s20 = int_to_ptr.vmem [resolvable:$true] %s16_s20 }
  0x10   :  { %s382_s21 = scalar_lea.vmem %s17_s20, 512  ;;  %p387_p6 = scmp.lt.s32.totalorder %s17_s20, %s17_s20 }
  0x11   :  { %p383_p5 = scmp.ne.s32.totalorder %s17_s20, %s382_s21  ;;  %p388_p7 = scmp.lt.s32.totalorder %s382_s21, %s382_s21 }
  0x13   :  { %p389_p8 = por %p388_p7, %p387_p6 }
  0x15   :  { %p390_p9 = pnand %p389_p8, %p383_p5 }
  0x17   :  { %393 = shalt.err (!%p390_p9)
}
  0x18   :  { %s444_s22 = smov 128   ;;  %s445_s23 = smov 8  }
  0x19   :  { %22 = dma.hbm_to_vmem [thread:$0]  %s503_s0, 512, %s17_s20, [#allocation3], %s444_s22, %s444_s22, %s445_s23  }
  0x1a   :  { %s446_s26 = smov [#allocation7]  }
  0x1b   :  { %s41_s27 = sshll.u32 %s446_s26, 4  ;;  %s42_s27 = int_to_ptr.vmem [resolvable:$true] %s41_s27 }
  0x1c   :  { %s402_s1 = scalar_lea.vmem %s42_s27, 64  ;;  %p407_p11 = scmp.lt.s32.totalorder %s42_s27, %s42_s27 }
  0x1d   :  { %p403_p10 = scmp.ne.s32.totalorder %s42_s27, %s402_s1  ;;  %p408_p12 = scmp.lt.s32.totalorder %s402_s1, %s402_s1 }
  0x1f   :  { %p409_p13 = por %p408_p12, %p407_p11 }
  0x21   :  { %p410_p0 = pnand %p409_p13, %p403_p10 }
  0x23   :  { %413 = shalt.err (!%p410_p0)
}
  0x24   :  { %44 = dma.hbm_to_vmem [thread:$0]  %s505_s2, 64, %s42_s27, [#allocation6]  }
  0x25   :  { %434 = dma.done.wait [#allocation3], 512  }
  0x26   :  { %435 = vsyncadd [#allocation3], 4294966784 }
  0x27   :  { %436 = dma.done.wait [#allocation6], 4160  }
  0x28   :  { %437 = vsyncadd [#allocation6], 4294963136  ;;  %v447_v0 = vmov 0.0   ;;  %v87_v1 = vld [vmem:[#allocation5 + $0xe8] sm:$0xff]  ;;  %v89_v2 = vld [vmem:[#allocation5 + $0xf8] sm:$0xff]  ;;  %vm112_vm0 = vcmask 523264   ;;  %v92_v37 = vlaneseq }
  0x29   :  { %189 = vmatprep.mubr.f32.mxu0 %v447_v0  ;;  %278 = vmatprep.mubr.f32.mxu1 %v447_v0  ;;  %v86_v3 = vld [vmem:[#allocation5 + $0xe0] sm:$0xff]  ;;  %v88_v4 = vld [vmem:[#allocation5 + $0xf0] sm:$0xff]  ;;  %v83_v5 = vld [vmem:[#allocation5 + $0xc8] sm:$0xff]  ;;  %s448_s0 = smov [#allocation8]  }
  0x2a   :  { %141 = vmatprep.subr.mxu0 %v87_v1  ;;  %230 = vmatprep.subr.mxu1 %v89_v2  ;;  %v85_v6 = vld [vmem:[#allocation5 + $0xd8] sm:$0xff]  ;;  %v82_v7 = vld [vmem:[#allocation5 + $0xc0] sm:$0xff]  ;;  %v84_v8 = vld [vmem:[#allocation5 + $0xd0] sm:$0xff]  ;;  %v93_v38 = vshrl.u32 %v92_v37, 7  ;;  %s324_s2 = sshll.u32 %s448_s0, 4  ;;  %s325_s2 = int_to_ptr.vmem [resolvable:$true] %s324_s2 }
  0x2b   :  { %142 = vmatpush1.msra.mxu0 %v86_v3  ;;  %231 = vmatpush1.msra.mxu1 %v88_v4  ;;  %v79_v9 = vld [vmem:[#allocation5 + $0xa8] sm:$0xff]  ;;  %v81_v10 = vld [vmem:[#allocation5 + $0xb8] sm:$0xff]  ;;  %v78_v11 = vld [vmem:[#allocation5 + $0xa0] sm:$0xff]  ;;  %s414_s30 = scalar_lea.vmem %s325_s2, 2048  ;;  %p419_p2 = scmp.lt.s32.totalorder %s325_s2, %s325_s2 }
  0x2c   :  { %143 = vmatprep.subr.mxu0 %v83_v5  ;;  %232 = vmatprep.subr.mxu1 %v85_v6  ;;  %v80_v12 = vld [vmem:[#allocation5 + $0xb0] sm:$0xff]  ;;  %v75_v13 = vld [vmem:[#allocation5 + $0x88] sm:$0xff]  ;;  %v77_v14 = vld [vmem:[#allocation5 + $0x98] sm:$0xff]  ;;  %v94_v39 = vsub.s32 0, %v93_v38  ;;  %v102_v40 = vsub.s32 2, %v93_v38  ;;  %v98_v42 = vsub.s32 1, %v93_v38  ;;  %p415_p1 = scmp.ne.s32.totalorder %s325_s2, %s414_s30  ;;  %p420_p3 = scmp.lt.s32.totalorder %s414_s30, %s414_s30 }
  0x2d   :  { %144 = vmatpush1.msra.mxu0 %v82_v7  ;;  %233 = vmatpush1.msra.mxu1 %v84_v8  ;;  %v74_v15 = vld [vmem:[#allocation5 + $0x80] sm:$0xff]  ;;  %v76_v16 = vld [vmem:[#allocation5 + $0x90] sm:$0xff]  ;;  %v71_v17 = vld [vmem:[#allocation5 + $0x68] sm:$0xff]  ;;  %v106_v43 = vsub.s32 3, %v93_v38 }
  0x2e   :  { %145 = vmatprep.subr.mxu0 %v79_v9  ;;  %234 = vmatprep.subr.mxu1 %v81_v10  ;;  %v73_v18 = vld [vmem:[#allocation5 + $0x78] sm:$0xff]  ;;  %v70_v19 = vld [vmem:[#allocation5 + $0x60] sm:$0xff]  ;;  %v72_v20 = vld [vmem:[#allocation5 + $0x70] sm:$0xff]  ;;  %p421_p4 = por %p420_p3, %p419_p2 }
  0x2f   :  { %146 = vmatpush1.msra.mxu0 %v78_v11  ;;  %235 = vmatpush1.msra.mxu1 %v80_v12  ;;  %v67_v21 = vld [vmem:[#allocation5 + $0x48] sm:$0xff]  ;;  %v69_v22 = vld [vmem:[#allocation5 + $0x58] sm:$0xff]  ;;  %v66_v23 = vld [vmem:[#allocation5 + $0x40] sm:$0xff] }
  0x30   :  { %147 = vmatprep.subr.mxu0 %v75_v13  ;;  %236 = vmatprep.subr.mxu1 %v77_v14  ;;  %v68_v24 = vld [vmem:[#allocation5 + $0x50] sm:$0xff]  ;;  %v63_v25 = vld [vmem:[#allocation5 + $0x28] sm:$0xff]  ;;  %v65_v26 = vld [vmem:[#allocation5 + $0x38] sm:$0xff]  ;;  %p422_p5 = pnand %p421_p4, %p415_p1 }
  0x31   :  { %148 = vmatpush1.msra.mxu0 %v74_v15  ;;  %237 = vmatpush1.msra.mxu1 %v76_v16  ;;  %v62_v27 = vld [vmem:[#allocation5 + $0x20] sm:$0xff]  ;;  %v64_v28 = vld [vmem:[#allocation5 + $0x30] sm:$0xff]  ;;  %v59_v29 = vld [vmem:[#allocation5 + $0x8] sm:$0xff] }
  0x32   :  { %149 = vmatprep.subr.mxu0 %v71_v17  ;;  %238 = vmatprep.subr.mxu1 %v73_v18  ;;  %v61_v30 = vld [vmem:[#allocation5 + $0x18] sm:$0xff]  ;;  %v58_v31 = vld [vmem:[#allocation5] sm:$0xff]  ;;  %v60_v32 = vld [vmem:[#allocation5 + $0x10] sm:$0xff] }
  0x33   :  { %150 = vmatpush1.msra.mxu0 %v70_v19  ;;  %239 = vmatpush1.msra.mxu1 %v72_v20  ;;  %v54_v33 = vld [vmem:[#allocation2] sm:$0xff]  ;;  %v55_v34 = vld [vmem:[#allocation2 + $0x8] sm:$0xff]  ;;  %v56_v35 = vld [vmem:[#allocation2 + $0x10] sm:$0xff] }
  0x34   :  { %151 = vmatprep.subr.mxu0 %v67_v21  ;;  %240 = vmatprep.subr.mxu1 %v69_v22  ;;  %v57_v36 = vld [vmem:[#allocation2 + $0x18] sm:$0xff]  ;;  %v90_v41 = vld [vmem:[#allocation7] sm:$0xf] }
  0x35   :  { %152 = vmatpush1.msra.mxu0 %v66_v23  ;;  %241 = vmatpush1.msra.mxu1 %v68_v24  ;;  %v95_v44 = vrot.slane %v90_v41, %v94_v39  ;;  %v103_v45 = vrot.slane %v90_v41, %v102_v40  ;;  %v99_v46 = vrot.slane %v90_v41, %v98_v42 }
  0x36   :  { %153 = vmatprep.subr.mxu0 %v63_v25  ;;  %242 = vmatprep.subr.mxu1 %v65_v26  ;;  %v107_v47 = vrot.slane %v90_v41, %v106_v43 }
  0x37   :  { %154 = vmatpush1.msra.mxu0 %v62_v27  ;;  %243 = vmatpush1.msra.mxu1 %v64_v28 }
  0x38   :  { %155 = vmatprep.subr.mxu0 %v59_v29  ;;  %244 = vmatprep.subr.mxu1 %v61_v30 }
  0x39   :  { %156 = vmatpush1.msra.mxu0 %v58_v31  ;;  %245 = vmatpush1.msra.mxu1 %v60_v32 }
  0x3a   :  { %337 = vmatmul.mubr.msk.f32.vlgmr.msra.gmra.mxu0 %vm112_vm0, %v54_v33  ;;  %341 = vmatmul.mubr.msk.f32.vlgmr.msra.gmra.mxu1 %vm112_vm0, %v54_v33 }
  0x3b   :  { %195 = vmatprep.mubr.f32.mxu0 %v447_v0  ;;  %284 = vmatprep.mubr.f32.mxu1 %v447_v0 }
  0x3e   :  { %338 = vmatmul.mubr.msk.f32.gmra.mxu0 %vm112_vm0, %v55_v34  ;;  %342 = vmatmul.mubr.msk.f32.gmra.mxu1 %vm112_vm0, %v55_v34 }
  0x3f   :  { %201 = vmatprep.mubr.f32.mxu0 %v447_v0  ;;  %290 = vmatprep.mubr.f32.mxu1 %v447_v0 }
  0x42   :  { %339 = vmatmul.mubr.msk.f32.gmra.mxu0 %vm112_vm0, %v56_v35  ;;  %343 = vmatmul.mubr.msk.f32.gmra.mxu1 %vm112_vm0, %v56_v35 }
  0x43   :  { %207 = vmatprep.mubr.f32.mxu0 %v447_v0  ;;  %296 = vmatprep.mubr.f32.mxu1 %v447_v0 }
  0x46   :  { %340 = vmatmul.mubr.msk.f32.gmra.mxu0 %vm112_vm0, %v57_v36  ;;  %344 = vmatmul.mubr.msk.f32.gmra.mxu1 %vm112_vm0, %v57_v36 }
  0xfa   :  { %v191_v48 = vpop.f32.mrf.mxu0  ;;  %v280_v49 = vpop.f32.mrf.mxu1 }
  0xfb   :  { %v192_v50 = vadd.f32 %v191_v48, %v95_v44  ;;  %v281_v51 = vadd.f32 %v280_v49, %v103_v45 }
  0xfc   :  { %v193_v52 = vpop.f32.mrf.mxu0  ;;  %v282_v53 = vpop.f32.mrf.mxu1 }
  0xfd   :  { %303 = vst [vmem:[#allocation8] sm:$0xff] %v192_v50  ;;  %305 = vst [vmem:[#allocation8 + $0x10] sm:$0xff] %v281_v51  ;;  %v194_v54 = vadd.f32 %v193_v52, %v99_v46  ;;  %v283_v55 = vadd.f32 %v282_v53, %v107_v47 }
  0xfe   :  { %v197_v56 = vpop.f32.mrf.mxu0  ;;  %v286_v57 = vpop.f32.mrf.mxu1 }
  0xff   :  { %304 = vst [vmem:[#allocation8 + $0x8] sm:$0xff] %v194_v54  ;;  %306 = vst [vmem:[#allocation8 + $0x18] sm:$0xff] %v283_v55  ;;  %v198_v58 = vadd.f32 %v197_v56, %v95_v44  ;;  %v287_v59 = vadd.f32 %v286_v57, %v103_v45 }
 0x100   :  { %v199_v60 = vpop.f32.mrf.mxu0  ;;  %v288_v61 = vpop.f32.mrf.mxu1 }
 0x101   :  { %307 = vst [vmem:[#allocation8 + $0x20] sm:$0xff] %v198_v58  ;;  %309 = vst [vmem:[#allocation8 + $0x30] sm:$0xff] %v287_v59  ;;  %v200_v62 = vadd.f32 %v199_v60, %v99_v46  ;;  %v289_v63 = vadd.f32 %v288_v61, %v107_v47 }
 0x102   :  { %v203_v0 = vpop.f32.mrf.mxu0  ;;  %v292_v1 = vpop.f32.mrf.mxu1 }
 0x103   :  { %308 = vst [vmem:[#allocation8 + $0x28] sm:$0xff] %v200_v62  ;;  %310 = vst [vmem:[#allocation8 + $0x38] sm:$0xff] %v289_v63  ;;  %v204_v2 = vadd.f32 %v203_v0, %v95_v44  ;;  %v293_v3 = vadd.f32 %v292_v1, %v103_v45 }
 0x104   :  { %v205_v4 = vpop.f32.mrf.mxu0  ;;  %v294_v5 = vpop.f32.mrf.mxu1 }
 0x105   :  { %311 = vst [vmem:[#allocation8 + $0x40] sm:$0xff] %v204_v2  ;;  %313 = vst [vmem:[#allocation8 + $0x50] sm:$0xff] %v293_v3  ;;  %v206_v6 = vadd.f32 %v205_v4, %v99_v46  ;;  %v295_v7 = vadd.f32 %v294_v5, %v107_v47 }
 0x106   :  { %v209_v8 = vpop.f32.mrf.mxu0  ;;  %v298_v9 = vpop.f32.mrf.mxu1 }
 0x107   :  { %312 = vst [vmem:[#allocation8 + $0x48] sm:$0xff] %v206_v6  ;;  %314 = vst [vmem:[#allocation8 + $0x58] sm:$0xff] %v295_v7  ;;  %v210_v10 = vadd.f32 %v209_v8, %v95_v44  ;;  %v299_v11 = vadd.f32 %v298_v9, %v103_v45 }
 0x108   :  { %v211_v12 = vpop.f32.mrf.mxu0  ;;  %v300_v13 = vpop.f32.mrf.mxu1 }
 0x109   :  { %315 = vst [vmem:[#allocation8 + $0x60] sm:$0xff] %v210_v10  ;;  %317 = vst [vmem:[#allocation8 + $0x70] sm:$0xff] %v299_v11  ;;  %v212_v14 = vadd.f32 %v211_v12, %v99_v46  ;;  %v301_v15 = vadd.f32 %v300_v13, %v107_v47 }
 0x10b   :  { %316 = vst [vmem:[#allocation8 + $0x68] sm:$0xff] %v212_v14  ;;  %318 = vst [vmem:[#allocation8 + $0x78] sm:$0xff] %v301_v15 }
 0x10c   :  { %425 = shalt.err (!%p422_p5)
}
 0x10d   :  { %330 = dma.vmem_to_hbm [thread:$0]  %s325_s2, 2048, %s506_s3, [#allocation4], %s441_s15, %s441_s15, %s442_s16  }
 0x10e   :  { %438 = dma.done.wait [#allocation4], 2048  }
 0x10f   :  { %439 = vsyncadd [#allocation4], 4294965248 }
 0x110   :  { %334 = vsyncpa [#allocation3], 1 }
 0x111   :  { %335 = vsyncpa [#allocation6], 1 }
 0x112   :  { %336 = vsyncpa [#allocation4], 1 }

// kernel: tpu_custom_call.1
= control target key start
LH: loop header
LB: loop body
LE: loop exit
PB: predicated region body
PF: predicated region fallthrough
CT: control target
= control target key end

     0   :  { %8 = vsyncpa [#allocation3], 0  ;;  %s503_s0 = inlined_call_operand.hbm [shape: f32[1,32,64], index: 0, kind: input, shape index: {}]   ;;  %s504_s1 = inlined_call_operand.hbm [shape: f32[64,512], index: 1, kind: input, shape index: {}]   ;;  %s505_s2 = inlined_call_operand.hbm [shape: f32[1,512], index: 2, kind: input, shape index: {}]   ;;  %s506_s3 = inlined_call_operand.hbm [shape: f32[32,512], index: 3, kind: output, shape index: {}]  }
   0x1   :  { %9 = vsyncpa [#allocation6], 0 }
   0x2   :  { %10 = vsyncpa [#allocation4], 0  ;;  %s440_s12 = smov [#allocation5]  }
   0x3   :  { %s28_s13 = sshll.u32 %s440_s12, 4  ;;  %s29_s13 = int_to_ptr.vmem [resolvable:$true] %s28_s13 }
   0x4   :  { %s362_s14 = scalar_lea.vmem %s29_s13, 4096  ;;  %p367_p1 = scmp.lt.s32.totalorder %s29_s13, %s29_s13 }
   0x5   :  { %p363_p0 = scmp.ne.s32.totalorder %s29_s13, %s362_s14  ;;  %p368_p2 = scmp.lt.s32.totalorder %s362_s14, %s362_s14 }
   0x7   :  { %p369_p3 = por %p368_p2, %p367_p1 }
   0x9   :  { %p370_p4 = pnand %p369_p3, %p363_p0 }
   0xb   :  { %373 = shalt.err (!%p370_p4)
}
   0xc   :  { %s441_s15 = smov 512   ;;  %s442_s16 = smov 32  }
   0xd   :  { %34 = dma.hbm_to_vmem [thread:$0]  %s504_s1, 4096, %s29_s13, [#allocation6], %s441_s15, %s441_s15, %s442_s16  }
   0xe   :  { %s443_s19 = smov [#allocation2]  }
   0xf   :  { %s16_s20 = sshll.u32 %s443_s19, 4  ;;  %s17_s20 = int_to_ptr.vmem [resolvable:$true] %s16_s20 }
  0x10   :  { %s382_s21 = scalar_lea.vmem %s17_s20, 512  ;;  %p387_p6 = scmp.lt.s32.totalorder %s17_s20, %s17_s20 }
  0x11   :  { %p383_p5 = scmp.ne.s32.totalorder %s17_s20, %s382_s21  ;;  %p388_p7 = scmp.lt.s32.totalorder %s382_s21, %s382_s21 }
  0x13   :  { %p389_p8 = por %p388_p7, %p387_p6 }
  0x15   :  { %p390_p9 = pnand %p389_p8, %p383_p5 }
  0x17   :  { %393 = shalt.err (!%p390_p9)
}
  0x18   :  { %s444_s22 = smov 128   ;;  %s445_s23 = smov 8  }
  0x19   :  { %22 = dma.hbm_to_vmem [thread:$0]  %s503_s0, 512, %s17_s20, [#allocation3], %s444_s22, %s444_s22, %s445_s23  }
  0x1a   :  { %s446_s26 = smov [#allocation7]  }
  0x1b   :  { %s41_s27 = sshll.u32 %s446_s26, 4  ;;  %s42_s27 = int_to_ptr.vmem [resolvable:$true] %s41_s27 }
  0x1c   :  { %s402_s1 = scalar_lea.vmem %s42_s27, 64  ;;  %p407_p11 = scmp.lt.s32.totalorder %s42_s27, %s42_s27 }
  0x1d   :  { %p403_p10 = scmp.ne.s32.totalorder %s42_s27, %s402_s1  ;;  %p408_p12 = scmp.lt.s32.totalorder %s402_s1, %s402_s1 }
  0x1f   :  { %p409_p13 = por %p408_p12, %p407_p11 }
  0x21   :  { %p410_p0 = pnand %p409_p13, %p403_p10 }
  0x23   :  { %413 = shalt.err (!%p410_p0)
}
  0x24   :  { %44 = dma.hbm_to_vmem [thread:$0]  %s505_s2, 64, %s42_s27, [#allocation6]  }
  0x25   :  { %434 = dma.done.wait [#allocation3], 512  }
  0x26   :  { %435 = vsyncadd [#allocation3], 4294966784 }
  0x27   :  { %436 = dma.done.wait [#allocation6], 4160  }
  0x28   :  { %437 = vsyncadd [#allocation6], 4294963136  ;;  %v447_v0 = vmov 0.0   ;;  %v87_v1 = vld [vmem:[#allocation5 + $0xe8] sm:$0xff]  ;;  %v89_v2 = vld [vmem:[#allocation5 + $0xf8] sm:$0xff]  ;;  %vm112_vm0 = vcmask 523264   ;;  %v92_v37 = vlaneseq }
  0x29   :  { %189 = vmatprep.mubr.f32.mxu0 %v447_v0  ;;  %278 = vmatprep.mubr.f32.mxu1 %v447_v0  ;;  %v86_v3 = vld [vmem:[#allocation5 + $0xe0] sm:$0xff]  ;;  %v88_v4 = vld [vmem:[#allocation5 + $0xf0] sm:$0xff]  ;;  %v83_v5 = vld [vmem:[#allocation5 + $0xc8] sm:$0xff]  ;;  %s448_s0 = smov [#allocation8]  }
  0x2a   :  { %141 = vmatprep.subr.mxu0 %v87_v1  ;;  %230 = vmatprep.subr.mxu1 %v89_v2  ;;  %v85_v6 = vld [vmem:[#allocation5 + $0xd8] sm:$0xff]  ;;  %v82_v7 = vld [vmem:[#allocation5 + $0xc0] sm:$0xff]  ;;  %v84_v8 = vld [vmem:[#allocation5 + $0xd0] sm:$0xff]  ;;  %v93_v38 = vshrl.u32 %v92_v37, 7  ;;  %s324_s2 = sshll.u32 %s448_s0, 4  ;;  %s325_s2 = int_to_ptr.vmem [resolvable:$true] %s324_s2 }
  0x2b   :  { %142 = vmatpush1.msra.mxu0 %v86_v3  ;;  %231 = vmatpush1.msra.mxu1 %v88_v4  ;;  %v79_v9 = vld [vmem:[#allocation5 + $0xa8] sm:$0xff]  ;;  %v81_v10 = vld [vmem:[#allocation5 + $0xb8] sm:$0xff]  ;;  %v78_v11 = vld [vmem:[#allocation5 + $0xa0] sm:$0xff]  ;;  %s414_s30 = scalar_lea.vmem %s325_s2, 2048  ;;  %p419_p2 = scmp.lt.s32.totalorder %s325_s2, %s325_s2 }
  0x2c   :  { %143 = vmatprep.subr.mxu0 %v83_v5  ;;  %232 = vmatprep.subr.mxu1 %v85_v6  ;;  %v80_v12 = vld [vmem:[#allocation5 + $0xb0] sm:$0xff]  ;;  %v75_v13 = vld [vmem:[#allocation5 + $0x88] sm:$0xff]  ;;  %v77_v14 = vld [vmem:[#allocation5 + $0x98] sm:$0xff]  ;;  %v94_v39 = vsub.s32 0, %v93_v38  ;;  %v102_v40 = vsub.s32 2, %v93_v38  ;;  %v98_v42 = vsub.s32 1, %v93_v38  ;;  %p415_p1 = scmp.ne.s32.totalorder %s325_s2, %s414_s30  ;;  %p420_p3 = scmp.lt.s32.totalorder %s414_s30, %s414_s30 }
  0x2d   :  { %144 = vmatpush1.msra.mxu0 %v82_v7  ;;  %233 = vmatpush1.msra.mxu1 %v84_v8  ;;  %v74_v15 = vld [vmem:[#allocation5 + $0x80] sm:$0xff]  ;;  %v76_v16 = vld [vmem:[#allocation5 + $0x90] sm:$0xff]  ;;  %v71_v17 = vld [vmem:[#allocation5 + $0x68] sm:$0xff]  ;;  %v106_v43 = vsub.s32 3, %v93_v38 }
  0x2e   :  { %145 = vmatprep.subr.mxu0 %v79_v9  ;;  %234 = vmatprep.subr.mxu1 %v81_v10  ;;  %v73_v18 = vld [vmem:[#allocation5 + $0x78] sm:$0xff]  ;;  %v70_v19 = vld [vmem:[#allocation5 + $0x60] sm:$0xff]  ;;  %v72_v20 = vld [vmem:[#allocation5 + $0x70] sm:$0xff]  ;;  %p421_p4 = por %p420_p3, %p419_p2 }
  0x2f   :  { %146 = vmatpush1.msra.mxu0 %v78_v11  ;;  %235 = vmatpush1.msra.mxu1 %v80_v12  ;;  %v67_v21 = vld [vmem:[#allocation5 + $0x48] sm:$0xff]  ;;  %v69_v22 = vld [vmem:[#allocation5 + $0x58] sm:$0xff]  ;;  %v66_v23 = vld [vmem:[#allocation5 + $0x40] sm:$0xff] }
  0x30   :  { %147 = vmatprep.subr.mxu0 %v75_v13  ;;  %236 = vmatprep.subr.mxu1 %v77_v14  ;;  %v68_v24 = vld [vmem:[#allocation5 + $0x50] sm:$0xff]  ;;  %v63_v25 = vld [vmem:[#allocation5 + $0x28] sm:$0xff]  ;;  %v65_v26 = vld [vmem:[#allocation5 + $0x38] sm:$0xff]  ;;  %p422_p5 = pnand %p421_p4, %p415_p1 }
  0x31   :  { %148 = vmatpush1.msra.mxu0 %v74_v15  ;;  %237 = vmatpush1.msra.mxu1 %v76_v16  ;;  %v62_v27 = vld [vmem:[#allocation5 + $0x20] sm:$0xff]  ;;  %v64_v28 = vld [vmem:[#allocation5 + $0x30] sm:$0xff]  ;;  %v59_v29 = vld [vmem:[#allocation5 + $0x8] sm:$0xff] }
  0x32   :  { %149 = vmatprep.subr.mxu0 %v71_v17  ;;  %238 = vmatprep.subr.mxu1 %v73_v18  ;;  %v61_v30 = vld [vmem:[#allocation5 + $0x18] sm:$0xff]  ;;  %v58_v31 = vld [vmem:[#allocation5] sm:$0xff]  ;;  %v60_v32 = vld [vmem:[#allocation5 + $0x10] sm:$0xff] }
  0x33   :  { %150 = vmatpush1.msra.mxu0 %v70_v19  ;;  %239 = vmatpush1.msra.mxu1 %v72_v20  ;;  %v54_v33 = vld [vmem:[#allocation2] sm:$0xff]  ;;  %v55_v34 = vld [vmem:[#allocation2 + $0x8] sm:$0xff]  ;;  %v56_v35 = vld [vmem:[#allocation2 + $0x10] sm:$0xff] }
  0x34   :  { %151 = vmatprep.subr.mxu0 %v67_v21  ;;  %240 = vmatprep.subr.mxu1 %v69_v22  ;;  %v57_v36 = vld [vmem:[#allocation2 + $0x18] sm:$0xff]  ;;  %v90_v41 = vld [vmem:[#allocation7] sm:$0xf] }
  0x35   :  { %152 = vmatpush1.msra.mxu0 %v66_v23  ;;  %241 = vmatpush1.msra.mxu1 %v68_v24  ;;  %v95_v44 = vrot.slane %v90_v41, %v94_v39  ;;  %v103_v45 = vrot.slane %v90_v41, %v102_v40  ;;  %v99_v46 = vrot.slane %v90_v41, %v98_v42 }
  0x36   :  { %153 = vmatprep.subr.mxu0 %v63_v25  ;;  %242 = vmatprep.subr.mxu1 %v65_v26  ;;  %v107_v47 = vrot.slane %v90_v41, %v106_v43 }
  0x37   :  { %154 = vmatpush1.msra.mxu0 %v62_v27  ;;  %243 = vmatpush1.msra.mxu1 %v64_v28 }
  0x38   :  { %155 = vmatprep.subr.mxu0 %v59_v29  ;;  %244 = vmatprep.subr.mxu1 %v61_v30 }
  0x39   :  { %156 = vmatpush1.msra.mxu0 %v58_v31  ;;  %245 = vmatpush1.msra.mxu1 %v60_v32 }
  0x3a   :  { %337 = vmatmul.mubr.msk.f32.vlgmr.msra.gmra.mxu0 %vm112_vm0, %v54_v33  ;;  %341 = vmatmul.mubr.msk.f32.vlgmr.msra.gmra.mxu1 %vm112_vm0, %v54_v33 }
  0x3b   :  { %195 = vmatprep.mubr.f32.mxu0 %v447_v0  ;;  %284 = vmatprep.mubr.f32.mxu1 %v447_v0 }
  0x3e   :  { %338 = vmatmul.mubr.msk.f32.gmra.mxu0 %vm112_vm0, %v55_v34  ;;  %342 = vmatmul.mubr.msk.f32.gmra.mxu1 %vm112_vm0, %v55_v34 }
  0x3f   :  { %201 = vmatprep.mubr.f32.mxu0 %v447_v0  ;;  %290 = vmatprep.mubr.f32.mxu1 %v447_v0 }
  0x42   :  { %339 = vmatmul.mubr.msk.f32.gmra.mxu0 %vm112_vm0, %v56_v35  ;;  %343 = vmatmul.mubr.msk.f32.gmra.mxu1 %vm112_vm0, %v56_v35 }
  0x43   :  { %207 = vmatprep.mubr.f32.mxu0 %v447_v0  ;;  %296 = vmatprep.mubr.f32.mxu1 %v447_v0 }
  0x46   :  { %340 = vmatmul.mubr.msk.f32.gmra.mxu0 %vm112_vm0, %v57_v36  ;;  %344 = vmatmul.mubr.msk.f32.gmra.mxu1 %vm112_vm0, %v57_v36 }
  0xfa   :  { %v191_v48 = vpop.f32.mrf.mxu0  ;;  %v280_v49 = vpop.f32.mrf.mxu1 }
  0xfb   :  { %v192_v50 = vadd.f32 %v191_v48, %v95_v44  ;;  %v281_v51 = vadd.f32 %v280_v49, %v103_v45 }
  0xfc   :  { %v193_v52 = vpop.f32.mrf.mxu0  ;;  %v282_v53 = vpop.f32.mrf.mxu1 }
  0xfd   :  { %303 = vst [vmem:[#allocation8] sm:$0xff] %v192_v50  ;;  %305 = vst [vmem:[#allocation8 + $0x10] sm:$0xff] %v281_v51  ;;  %v194_v54 = vadd.f32 %v193_v52, %v99_v46  ;;  %v283_v55 = vadd.f32 %v282_v53, %v107_v47 }
  0xfe   :  { %v197_v56 = vpop.f32.mrf.mxu0  ;;  %v286_v57 = vpop.f32.mrf.mxu1 }
  0xff   :  { %304 = vst [vmem:[#allocation8 + $0x8] sm:$0xff] %v194_v54  ;;  %306 = vst [vmem:[#allocation8 + $0x18] sm:$0xff] %v283_v55  ;;  %v198_v58 = vadd.f32 %v197_v56, %v95_v44  ;;  %v287_v59 = vadd.f32 %v286_v57, %v103_v45 }
 0x100   :  { %v199_v60 = vpop.f32.mrf.mxu0  ;;  %v288_v61 = vpop.f32.mrf.mxu1 }
 0x101   :  { %307 = vst [vmem:[#allocation8 + $0x20] sm:$0xff] %v198_v58  ;;  %309 = vst [vmem:[#allocation8 + $0x30] sm:$0xff] %v287_v59  ;;  %v200_v62 = vadd.f32 %v199_v60, %v99_v46  ;;  %v289_v63 = vadd.f32 %v288_v61, %v107_v47 }
 0x102   :  { %v203_v0 = vpop.f32.mrf.mxu0  ;;  %v292_v1 = vpop.f32.mrf.mxu1 }
 0x103   :  { %308 = vst [vmem:[#allocation8 + $0x28] sm:$0xff] %v200_v62  ;;  %310 = vst [vmem:[#allocation8 + $0x38] sm:$0xff] %v289_v63  ;;  %v204_v2 = vadd.f32 %v203_v0, %v95_v44  ;;  %v293_v3 = vadd.f32 %v292_v1, %v103_v45 }
 0x104   :  { %v205_v4 = vpop.f32.mrf.mxu0  ;;  %v294_v5 = vpop.f32.mrf.mxu1 }
 0x105   :  { %311 = vst [vmem:[#allocation8 + $0x40] sm:$0xff] %v204_v2  ;;  %313 = vst [vmem:[#allocation8 + $0x50] sm:$0xff] %v293_v3  ;;  %v206_v6 = vadd.f32 %v205_v4, %v99_v46  ;;  %v295_v7 = vadd.f32 %v294_v5, %v107_v47 }
 0x106   :  { %v209_v8 = vpop.f32.mrf.mxu0  ;;  %v298_v9 = vpop.f32.mrf.mxu1 }
 0x107   :  { %312 = vst [vmem:[#allocation8 + $0x48] sm:$0xff] %v206_v6  ;;  %314 = vst [vmem:[#allocation8 + $0x58] sm:$0xff] %v295_v7  ;;  %v210_v10 = vadd.f32 %v209_v8, %v95_v44  ;;  %v299_v11 = vadd.f32 %v298_v9, %v103_v45 }
 0x108   :  { %v211_v12 = vpop.f32.mrf.mxu0  ;;  %v300_v13 = vpop.f32.mrf.mxu1 }
 0x109   :  { %315 = vst [vmem:[#allocation8 + $0x60] sm:$0xff] %v210_v10  ;;  %317 = vst [vmem:[#allocation8 + $0x70] sm:$0xff] %v299_v11  ;;  %v212_v14 = vadd.f32 %v211_v12, %v99_v46  ;;  %v301_v15 = vadd.f32 %v300_v13, %v107_v47 }
 0x10b   :  { %316 = vst [vmem:[#allocation8 + $0x68] sm:$0xff] %v212_v14  ;;  %318 = vst [vmem:[#allocation8 + $0x78] sm:$0xff] %v301_v15 }
 0x10c   :  { %425 = shalt.err (!%p422_p5)
}
 0x10d   :  { %330 = dma.vmem_to_hbm [thread:$0]  %s325_s2, 2048, %s506_s3, [#allocation4], %s441_s15, %s441_s15, %s442_s16  }
 0x10e   :  { %438 = dma.done.wait [#allocation4], 2048  }
 0x10f   :  { %439 = vsyncadd [#allocation4], 4294965248 }
 0x110   :  { %334 = vsyncpa [#allocation3], 1 }
 0x111   :  { %335 = vsyncpa [#allocation6], 1 }
 0x112   :  { %336 = vsyncpa [#allocation4], 1 }

</bundles_post_ra>
